<compile_context>
chip_gen: v5e
topology: v5e:2x2
jax: 0.10.0
libtpu: 0.0.40
codegen_flags: <defaults>
</compile_context>

<pallas_src>
import functools

import jax
import jax.numpy as jnp
import numpy as np
from jax import lax
from jax.experimental import pallas as pl
from jax.experimental.pallas import tpu as pltpu


def _rope_kernel(x_ref, cos_ref, sin_ref, o_ref):
    x = x_ref[...]                                        # (1, tT, W)
    W = x.shape[-1]
    # Interleaved rotate-half via XLU rolls (co-issue with the VPU FMAs):
    #   x_next[j] = x[(j+1) % W]  (even lanes pick this -> neighbour b of pair)
    #   x_prev[j] = x[(j-1) % W]  (odd  lanes pick this -> neighbour a of pair)
    # The parity select never picks a wrapped element (lane 0 is even, lane
    # W-1 is odd), which also protects the sub-row boundaries introduced by
    # the H<128 lane packing done in the wrapper.
    x_next = pltpu.roll(x, shift=W - 1, axis=x.ndim - 1)
    x_prev = pltpu.roll(x, shift=1, axis=x.ndim - 1)
    lane = lax.broadcasted_iota(jnp.int32, x.shape, x.ndim - 1)
    swapped = jnp.where((lane & 1) == 0, x_next, x_prev)
    # sin_ref already carries the sign: -sin on even lanes, +sin on odd lanes.
    out = x * cos_ref[...] + swapped * sin_ref[...]
    o_ref[...] = out.astype(o_ref.dtype)


@functools.lru_cache(maxsize=None)
def _rope_tables(dim, max_seq_len, tab_dtype_name, pack):
    """Cos + signed-sin tables, built once (PyTorch registered-buffer analogue)."""
    inv_freq = 1.0 / (10000.0 ** (np.arange(0, dim, 2, dtype=np.float32) / dim))
    pos = np.arange(max_seq_len, dtype=np.float32)
    ang = pos[:, None] * inv_freq[None, :]                 # [L, dim//2]
    cos_full = np.repeat(np.cos(ang), 2, axis=-1)          # [L, dim]
    sin_pair = np.repeat(np.sin(ang), 2, axis=-1)          # [L, dim]
    sign = np.where(np.arange(dim) % 2 == 0, -1.0, 1.0).astype(np.float32)
    sin_signed = sin_pair * sign[None, :]                  # -sin even / +sin odd
    if pack > 1:
        cos_full = cos_full.reshape(max_seq_len // pack, pack * dim)
        sin_signed = sin_signed.reshape(max_seq_len // pack, pack * dim)
    dt = jnp.dtype(tab_dtype_name)
    return jnp.asarray(cos_full, dtype=dt), jnp.asarray(sin_signed, dtype=dt)


@functools.lru_cache(maxsize=None)
def _vmem_capacity_bytes():
    try:
        cap = int(getattr(pltpu.get_tpu_info(), "vmem_capacity_bytes", 0))
        if cap > 0:
            return cap
    except Exception:
        pass
    return 64 * 1024 * 1024        # conservative fallback (v7x-sized)


def _sublane_multiple(dtype):
    itemsize = jnp.dtype(dtype).itemsize
    return max(8, 8 * (4 // max(itemsize, 1)))   # f32 -> 8, bf16 -> 16, int8 -> 32


def _pick_tile_t(T_work, W, x_itemsize, tab_itemsize, sublane):
    """Largest sequence tile whose double-buffered working set fits the budget."""
    # Per grid step: x-in + out blocks (x dtype) and 2 table blocks, all
    # double-buffered by the pipeline.
    bytes_per_row = 2 * (2 * W * x_itemsize) + 2 * (2 * W * tab_itemsize)
    budget = min(24 * 1024 * 1024, _vmem_capacity_bytes() // 3)
    tT = budget // max(bytes_per_row, 1)
    tT = max(sublane, (tT // sublane) * sublane)
    tT = min(tT, 8192)                                   # keep single DMAs sane
    t_ceil = ((T_work + sublane - 1) // sublane) * sublane
    return min(tT, t_ceil)


def rotary_positional_embedding(x, dim, max_seq_len=4096):
    """Interleaved RoPE. x: [B, T, H] with H == dim (dim even). Same shape/dtype out."""
    B, T, H = x.shape
    assert H == dim and dim % 2 == 0
    assert T <= max_seq_len

    x_dtype = jnp.dtype(x.dtype)
    low_prec = x_dtype in (jnp.dtype(jnp.bfloat16), jnp.dtype(jnp.float16))
    tab_dtype = x_dtype if low_prec else jnp.dtype(jnp.float32)

    # Lane-pack narrow heads: fold k = 128//H consecutive positions into the
    # lane dim so every vreg / store is lane-dense.  Tables use the same packing.
    k = 1
    if H < 128 and 128 % H == 0 and max_seq_len % (128 // H) == 0:
        k = 128 // H
    cos_tab, sin_tab = _rope_tables(dim, max_seq_len, tab_dtype.name, k)

    if k > 1:
        T_pad = ((T + k - 1) // k) * k
        if T_pad != T:
            x = jnp.pad(x, ((0, 0), (0, T_pad - T), (0, 0)))
        x = x.reshape(B, T_pad // k, k * H)
        T_work, W = T_pad // k, k * H
    else:
        T_work, W = T, H

    sublane = _sublane_multiple(x_dtype)
    tT = _pick_tile_t(T_work, W, x_dtype.itemsize, tab_dtype.itemsize, sublane)
    num_t = pl.cdiv(T_work, tT)

    # T tiles outer / batch inner keeps the table block index constant across
    # batch steps (no re-DMA).  If T fits in one tile, put batch first so a
    # >=2-sized parallel axis exists for v7x megacore sharding.
    if num_t >= 2 or B == 1:
        grid = (num_t, B)
        x_map = lambda t, b: (b, t, 0)
        tab_map = lambda t, b: (t, 0)
    else:
        grid = (B, num_t)
        x_map = lambda b, t: (b, t, 0)
        tab_map = lambda b, t: (t, 0)

    out = pl.pallas_call(
        _rope_kernel,
        out_shape=jax.ShapeDtypeStruct((B, T_work, W), x_dtype),
        grid_spec=pltpu.PrefetchScalarGridSpec(
            num_scalar_prefetch=0,
            grid=grid,
            in_specs=[
                pl.BlockSpec((1, tT, W), x_map),      # x
                pl.BlockSpec((tT, W), tab_map),       # cos
                pl.BlockSpec((tT, W), tab_map),       # signed sin
            ],
            out_specs=pl.BlockSpec((1, tT, W), x_map),
        ),
        compiler_params=pltpu.CompilerParams(
            dimension_semantics=("parallel", "parallel"),
            vmem_limit_bytes=48 * 1024 * 1024,
        ),
    )(x, cos_tab, sin_tab)

    if k > 1:
        out = out.reshape(B, T_work * k, H)
        if T_work * k != T:
            out = out[:, :T, :]
    return out


def _rope_reference(x, dim):
    """Pure-JAX port of the PyTorch forward, for validation."""
    B, T, H = x.shape
    inv_freq = 1.0 / (10000.0 ** (jnp.arange(0, dim, 2, dtype=jnp.float32) / dim))
    position = jnp.arange(T, dtype=jnp.float32)
    ang = position[:, None] * inv_freq[None, :]                 # [T, dim//2]
    sin = jnp.sin(ang)[None, :, :, None]
    cos = jnp.cos(ang)[None, :, :, None]
    xr = x.reshape(B, T, dim // 2, 2)
    x1, x2 = xr[..., 0:1], xr[..., 1:2]
    rot = jnp.concatenate([-x2, x1], axis=-1)
    out = xr * cos + rot * sin
    return out.reshape(B, T, H)


if __name__ == "__main__":
    key = jax.random.PRNGKey(0)
    k1, k2, k3 = jax.random.split(key, 3)

    # Lane-dense main case: B=2, T=8, H=dim=128, f32.
    x = jax.random.normal(k1, (2, 8, 128), dtype=jnp.float32)
    out = jax.block_until_ready(rotary_positional_embedding(x, dim=128))
    np.testing.assert_allclose(np.asarray(out),
                               np.asarray(_rope_reference(x, 128)),
                               rtol=1e-5, atol=1e-5)

    # Narrow-H ragged case: exercises the 128-lane packing path (k=4).
    x2 = jax.random.normal(k2, (2, 12, 32), dtype=jnp.float32)
    out2 = jax.block_until_ready(rotary_positional_embedding(x2, dim=32))
    np.testing.assert_allclose(np.asarray(out2),
                               np.asarray(_rope_reference(x2, 32)),
                               rtol=1e-5, atol=1e-5)

    # bf16 activations: bf16 tables (halved table HBM traffic); looser tolerance.
    x3 = jax.random.normal(k3, (2, 10, 64), dtype=jnp.bfloat16)
    out3 = jax.block_until_ready(rotary_positional_embedding(x3, dim=64))
    ref3 = _rope_reference(x3.astype(jnp.float32), 64)
    np.testing.assert_allclose(np.asarray(out3.astype(jnp.float32)),
                               np.asarray(ref3), rtol=5e-2, atol=5e-2)

    print("KERNEL_OK")
</pallas_src>

<mosaic_0001>
module attributes {stable_mosaic.version = 11 : i64} {
  func.func @_rope_kernel(%arg0: i32, %arg1: i32, %arg2: memref<1x8x128xf32, #tpu.memory_space<vmem>>, %arg3: memref<8x128xf32, #tpu.memory_space<vmem>>, %arg4: memref<8x128xf32, #tpu.memory_space<vmem>>, %arg5: memref<1x8x128xf32, #tpu.memory_space<vmem>>) attributes {dimension_semantics = [#tpu.dimension_semantics<parallel>, #tpu.dimension_semantics<parallel>], iteration_bounds = array<i64: 2, 1>, scalar_prefetch = 0 : i64, scratch_operands = 0 : i64, tpu.core_type = #tpu.core_type<tc>, window_params = [{transform_indices = @transform_0, window_bounds = array<i64: 1, 8, 128>}, {transform_indices = @transform_1, window_bounds = array<i64: 8, 128>}, {transform_indices = @transform_2, window_bounds = array<i64: 8, 128>}, {transform_indices = @transform_3, window_bounds = array<i64: 1, 8, 128>}]} {
    %c0 = arith.constant 0 : index
    %c0_0 = arith.constant 0 : index
    %c0_1 = arith.constant 0 : index
    %0 = vector.load %arg2[%c0, %c0_0, %c0_1] : memref<1x8x128xf32, #tpu.memory_space<vmem>>, vector<1x8x128xf32>
    %c127_i32 = arith.constant 127 : i32
    %1 = tpu.dynamic_rotate %0 by %c127_i32 dim 2 : vector<1x8x128xf32>, i32 -> vector<1x8x128xf32>
    %c1_i32 = arith.constant 1 : i32
    %2 = tpu.dynamic_rotate %0 by %c1_i32 dim 2 : vector<1x8x128xf32>, i32 -> vector<1x8x128xf32>
    %3 = tpu.iota {dimensions = array<i32: 2>} : vector<1x8x128xi32>
    %c1_i32_2 = arith.constant 1 : i32
    %4 = vector.broadcast %c1_i32_2 : i32 to vector<1x8x128xi32>
    %5 = arith.andi %3, %4 : vector<1x8x128xi32>
    %c0_i32 = arith.constant 0 : i32
    %6 = vector.broadcast %c0_i32 : i32 to vector<1x8x128xi32>
    %7 = arith.cmpi eq, %5, %6 : vector<1x8x128xi32>
    %8 = arith.select %7, %1, %2 : vector<1x8x128xi1>, vector<1x8x128xf32>
    %c0_3 = arith.constant 0 : index
    %c0_4 = arith.constant 0 : index
    %9 = vector.load %arg3[%c0_3, %c0_4] : memref<8x128xf32, #tpu.memory_space<vmem>>, vector<8x128xf32>
    %10 = vector.shape_cast %9 : vector<8x128xf32> to vector<1x8x128xf32>
    %11 = arith.mulf %0, %10 : vector<1x8x128xf32>
    %c0_5 = arith.constant 0 : index
    %c0_6 = arith.constant 0 : index
    %12 = vector.load %arg4[%c0_5, %c0_6] : memref<8x128xf32, #tpu.memory_space<vmem>>, vector<8x128xf32>
    %13 = vector.shape_cast %12 : vector<8x128xf32> to vector<1x8x128xf32>
    %14 = arith.mulf %8, %13 : vector<1x8x128xf32>
    %15 = arith.addf %11, %14 : vector<1x8x128xf32>
    %c0_7 = arith.constant 0 : index
    %c0_8 = arith.constant 0 : index
    %c0_9 = arith.constant 0 : index
    %16 = vector.load %arg5[%c0_7, %c0_8, %c0_9] : memref<1x8x128xf32, #tpu.memory_space<vmem>>, vector<1x8x128xf32>
    tpu.vector_store %arg5[%c0_7, %c0_8, %c0_9], %15 {strides = array<i32>} : memref<1x8x128xf32, #tpu.memory_space<vmem>>, vector<1x8x128xf32>,
    return
  }
  func.func @transform_0(%arg0: i32, %arg1: i32) -> (i32, i32, i32) {
    %c0_i32 = arith.constant 0 : i32
    %c0_i32_0 = arith.constant 0 : i32
    return %arg0, %arg1, %c0_i32 : i32, i32, i32
  }
  func.func @transform_1(%arg0: i32, %arg1: i32) -> (i32, i32) {
    %c0_i32 = arith.constant 0 : i32
    %c0_i32_0 = arith.constant 0 : i32
    return %arg1, %c0_i32 : i32, i32
  }
  func.func @transform_2(%arg0: i32, %arg1: i32) -> (i32, i32) {
    %c0_i32 = arith.constant 0 : i32
    %c0_i32_0 = arith.constant 0 : i32
    return %arg1, %c0_i32 : i32, i32
  }
  func.func @transform_3(%arg0: i32, %arg1: i32) -> (i32, i32, i32) {
    %c0_i32 = arith.constant 0 : i32
    %c0_i32_0 = arith.constant 0 : i32
    return %arg0, %arg1, %c0_i32 : i32, i32, i32
  }
}

</mosaic_0001>

<bundles_post_ra>
// kernel: tpu_custom_call.1
= control target key start
LH: loop header
LB: loop body
LE: loop exit
PB: predicated region body
PF: predicated region fallthrough
CT: control target
= control target key end

     0   :  { %8 = vsyncpa [#allocation3], 0  ;;  %s830_s0 = inlined_call_operand.hbm [shape: f32[2,8,128], index: 0, kind: input, shape index: {}]   ;;  %s831_s1 = inlined_call_operand.hbm [shape: f32[4096,128], index: 1, kind: input, shape index: {}]   ;;  %s832_s2 = inlined_call_operand.hbm [shape: f32[4096,128], index: 2, kind: input, shape index: {}]   ;;  %s833_s3 = inlined_call_operand.hbm [shape: f32[2,8,128], index: 3, kind: output, shape index: {}]  }
   0x1   :  { %10 = vsyncpa [#allocation3 + $0x1], 0 }
   0x2   :  { %11 = vsyncpa [#allocation6], 0 }
   0x3   :  { %12 = vsyncpa [#allocation4], 0 }
   0x4   :  { %14 = vsyncpa [#allocation4 + $0x1], 0  ;;  %s688_s12 = smov 0   ;;  %s690_s13 = smov 0  }
   0x5   :  { %s692_s14 = smov 0   ;;  %s694_s15 = smov 0  }
   0x6   :  { %s696_s16 = smov 0   ;;  %s698_s17 = smov 0  }
   0x7 LB: > { %s384_s18 = sadd.s32 4294967295, %s662_s17   ;;  %s385_s19 = sadd.s32 4294967294, %s662_s17   ;;  %s662_s17 = sphi %s698_s17, %s20_s17   ;;  %s658_s16 = sphi %s696_s16, %s843_s16   ;;  %s654_s15 = sphi %s694_s15, %s842_s15   ;;  %s650_s14 = sphi %s692_s14, %s841_s14   ;;  %s646_s13 = sphi %s690_s13, %s840_s13   ;;  %s642_s12 = sphi %s688_s12, %s839_s12  }
   0x8   : > { %p54_p0 = scmp.ne.s32.totalorder %s646_s13, %s642_s12  ;;  %p722_p1 = scmp.eq.s32.totalorder %s384_s18, 0 }
   0x9   : > { %p138_p2 = scmp.eq.s32.totalorder %s385_s19, 1  ;;  %p386_p4 = scmp.ge.s32.totalorder %s662_s17, 1 }
   0xa   : > { %p728_p3 = por %p722_p1, %p54_p0  ;;  %p145_p6 = scmp.lt.s32.totalorder %s662_s17, 3 }
   0xb   : > { %p733_p5 = por %p138_p2, %p54_p0  ;;  %s159_s25 = sshll.u32 %s831_s1, 4  ;;  %s160_s25 = int_to_ptr.hbm [resolvable:$true] %s159_s25 }
   0xc   : > { %p741_p7 = pnand %p386_p4, %p145_p6  ;;  %p389_p8 = scmp.ge.s32.totalorder %s662_s17, 2 }
   0xd   : > { %s664_s27 = smov [#allocation5]   ;;  %s173_s4 = sshll.u32 %s832_s2, 4  ;;  %s174_s4 = int_to_ptr.hbm [resolvable:$true] %s173_s4 }
   0xe   : > { %p413_p9 = pneg %p741_p7  ;;  %s161_s28 = sshll.u32 %s664_s27, 4  ;;  %s162_s28 = int_to_ptr.vmem [resolvable:$true] %s161_s28 }
   0xf   : > { %s665_s5 = smov [#allocation7]   ;;  %p132_p11 = scmp.eq.s32.totalorder %s384_s18, 1 }
  0x10   : > { %p414_p10 = pnand %p413_p9, %p722_p1  ;;  %s175_s6 = sshll.u32 %s665_s5, 4  ;;  %s176_s6 = int_to_ptr.vmem [resolvable:$true] %s175_s6 }
  0x11   : > { %s32_s7 = sadd.s32 1, %s658_s16  ;;  %s41_s8 = sadd.s32 1, %s650_s14 }
  0x12   : > { %416 = dma.hbm_to_vmem [thread:$0]  (!%p414_p10), %s160_s25, 128, %s162_s28, [#allocation6]  }
  0x13   : > { %419 = dma.hbm_to_vmem [thread:$0]  (!%p414_p10), %s174_s4, 128, %s176_s6, [#allocation6]  }
  0x14   : > { %p34_p12 = scmp.ge.s32.totalorder %s32_s7, 2  ;;  %p48_p13 = scmp.ne.s32.totalorder %s650_s14, %s646_s13 }
  0x15   : > { %p49_p0 = scmp.eq.s32.totalorder %s662_s17, 0  ;;  %p430_p4 = scmp.lt.s32.totalorder %s662_s17, 2 }
  0x16   : > { %s845_s7 = smov (%p34_p12, %s32_s7), 0  ;;  %p760_p2 = por %p132_p11, %p48_p13 }
  0x17   : > { %s36_s10 = ssub.s32 %s658_s16, %s845_s7  ;;  %s186_s11 = sand.u32 1, %s650_s14  }
  0x18   : > { %p39_p6 = scmp.eq.s32.totalorder %s36_s10, 0  ;;  %p50_p9 = por %p49_p0, %p48_p13 }
  0x19   : > { %s390_s19 = sshll.u32 %s186_s11, 3  ;;  %s391_s18 = sshll.u32 %s658_s16, 3 }
  0x1a   : > { %s770_s23 = scalar_select %p39_p6, %s650_s14, %s41_s8  }
  0x1b   : > { %s195_s27 = scalar_lea.hbm %s830_s0, %s391_s18  ;;  %s190_s29 = scalar_lea.vmem [#allocation2], %s390_s19 }
  0x1c   : > { %s197_s28 = sshll.u32 %s195_s27, 4  ;;  %s199_s30 = sshll.u32 %s190_s29, 4  ;;  %s198_s28 = int_to_ptr.hbm [resolvable:$true] %s197_s28  ;;  %s200_s30 = int_to_ptr.vmem [resolvable:$true] %s199_s30 }
  0x1d   : > { %p421_p10 = pnand %p430_p4, %p50_p9  ;;  %s187_s4 = scalar_lea.sflag [#allocation3], %s186_s11 }
  0x1e   : > { %208 = sbr.rel (%p741_p7) target bundleno = 170 (0xaa), region = 32  ;;  %s780_s5 = sand.u32 (!%p741_p7), 1, %s646_s13  }
  0x1f   : > { %423 = dma.hbm_to_vmem [thread:$0]  (!%p421_p10), %s198_s28, 128, %s200_s30, %s187_s4  }
  0x20   : > { %s393_s6 = sshll.u32 (!%p741_p7), %s780_s5, 3  ;;  %s211_s8 = scalar_lea.sflag (!%p741_p7), [#allocation3], %s780_s5 }
  0x21   : > { %s214_s10 = scalar_lea.vmem (!%p741_p7), [#allocation2], %s393_s6 }
  0x23   : > { %629 = dma.done.wait (%p728_p3), %s211_s8, 128  }
  0x24   : > { %631 = vsyncadd (%p728_p3), %s211_s8, 4294967168 }
  0x25   : > { %633 = dma.done.wait (%p722_p1), [#allocation6], 256  }
  0x26   : > { %635 = vsyncadd (%p722_p1), [#allocation6], 4294967040  ;;  %v248_v0 = vld [vmem:[%s214_s10] sm:$0xff]  ;;  %s666_s26 = smov 127   ;;  %s667_s11 = smov 1   ;;  %v253_v1 = vlaneseq  ;;  %v258_v5 = vld [vmem:[#allocation5] sm:$0xff] }
  0x27   : > { %249 = vrot.lane.b32.xlu0 %v248_v0, %s666_s26  ;;  %s398_s19 = sshll.u32 %s654_s15, 3  ;;  %v260_v6 = vld [vmem:[#allocation7] sm:$0xff]  ;;  %v259_v7 = vmul.f32 %v258_v5, %v248_v0  ;;  %s247_s20 = scalar_lea.vmem [#allocation8], %s393_s6 }
  0x28   : > { %v254_v2 = vand.u32 127, %v253_v1  ;;  %s276_s24 = scalar_lea.hbm %s833_s3, %s398_s19  ;;  %s278_s25 = sshll.u32 %s247_s20, 4  ;;  %s279_s25 = int_to_ptr.vmem [resolvable:$true] %s278_s25 }
  0x29   : > { %s280_s27 = sshll.u32 %s276_s24, 4  ;;  %s265_s15 = scalar_lea.sflag [#allocation4], %s780_s5  ;;  %s281_s27 = int_to_ptr.hbm [resolvable:$true] %s280_s27 }
  0x2a   : > { %v255_v4 = vand.u32 1, %v254_v2  ;;  %s590_s28 = sshra.s32 %s281_s27, 4  ;;  %s596_s8 = scalar_lea.hbm %s833_s3, 16  ;;  %s591_s28 = int_to_ptr.hbm [resolvable:$true] %s590_s28 }
  0x2b   : > { %s592_s29 = scalar_lea.hbm %s591_s28, 8  ;;  %p597_p11 = scmp.lt.s32.totalorder %s591_s28, %s833_s3 }
  0x2c   : > { %vm256_vm0 = vcmp.eq.s32.totalorder %v255_v4, 0  ;;  %p593_p1 = scmp.ne.s32.totalorder %s591_s28, %s592_s29  ;;  %p598_p12 = scmp.lt.s32.totalorder %s596_s8, %s592_s29 }
  0x2e   : > { %p594_p3 = pnand %p593_p1, %p760_p2  ;;  %p599_p13 = por %p598_p12, %p597_p11 }
  0x2f   : > { %251 = vrot.lane.b32.xlu0 %v248_v0, %s667_s11 }
  0x30   : > { %p595_p7 = pneg %p594_p3 }
  0x32   : > { %p600_p0 = pnand %p599_p13, %p595_p7 }
  0x99   : > { %v250_v3 = vpop.permute.xlu0 %249 }
  0xa1   : > { %v252_v8 = vpop.permute.xlu0 %251 }
  0xa2   : > { %v257_v9 = vsel %vm256_vm0, %v250_v3, %v252_v8 }
  0xa3   : > { %v261_v10 = vmul.f32 %v260_v6, %v257_v9 }
  0xa5   : > { %v262_v11 = vadd.f32 %v261_v10, %v259_v7 }
  0xa7   : > { %263 = vst [vmem:[%s247_s20] sm:$0xff] %v262_v11 }
  0xa8   : > { %603 = shalt.err (!%p600_p0)
}
  0xa9   : > { %411 = dma.vmem_to_hbm [thread:$0]  (%p760_p2), %s279_s25, 128, %s281_s27, %s265_s15  }
  0xaa PF: > { %s292_s5 = sand.u32 1, %s642_s12   ;;  %p425_p4 = pnand %p389_p8, %p733_p5 }
  0xab   : > { %s293_s26 = scalar_lea.sflag [#allocation4], %s292_s5 }
  0xac   : > { %p426_p6 = pneg %p425_p4 }
  0xae   : > { %637 = dma.done.wait (%p426_p6), %s293_s26, 128  }
  0xaf   : > { %639 = vsyncadd (%p426_p6), %s293_s26, 4294967168  ;;  %s20_s17 = sadd.s32 1, %s662_s17   ;;  %s839_s12 = smov %s646_s13 }
  0xb0   : > { %p17_p9 = scmp.ge.s32.totalorder %s20_s17, 4   ;;  %s840_s13 = smov %s650_s14 }
  0xb1   : > { %s841_s14 = smov %s770_s23  ;;  %s842_s15 = smov %s658_s16 }
  0xb2   : > { %s843_s16 = smov %s845_s7  ;;  %19 = sbr.rel (!%p17_p9) target bundleno = 7 (0x7), region = 87 }
  0xb7   :  { %299 = vsyncpa [#allocation3], 1 }
  0xb8   :  { %301 = vsyncpa [#allocation3 + $0x1], 1 }
  0xb9   :  { %302 = vsyncpa [#allocation6], 1 }
  0xba   :  { %303 = vsyncpa [#allocation4], 1 }
  0xbb   :  { %305 = vsyncpa [#allocation4 + $0x1], 1 }

</bundles_post_ra>
